<compile_context>
chip_gen: v5e
topology: v5e:2x2
jax: 0.10.0
libtpu: 0.0.40
codegen_flags: <defaults>
</compile_context>

<pallas_src>
import jax
import jax.numpy as jnp
from jax import lax
from jax.experimental import pallas as pl
from jax.experimental.pallas import tpu as pltpu


def _cdiv(a, b):
    return -(-a // b)


def _tpu_profile():
    """Best-effort (VMEM bytes, TensorCores-per-chip) with safe fallbacks."""
    vmem_bytes = 64 * 1024 * 1024          # conservative default (v7x-class)
    num_cores = 1                          # single TC unless positively detected
    try:
        info = pltpu.get_tpu_info()
        v = getattr(info, "vmem_capacity_bytes", None)
        if v is not None:
            vmem_bytes = int(v)
        for attr in ("num_tensorcores", "tensorcores_per_chip",
                     "num_cores_per_chip", "num_cores"):
            c = getattr(info, attr, None)
            if c is None:
                continue
            c = int(c)
            if c > 0:
                num_cores = min(c, 2)
                break
    except Exception:
        pass
    return vmem_bytes, num_cores


def _make_mse_kernel(rows_per_tile, W, R, tiles_per_p, full_tiles,
                     needs_mask, two_d_grid):
    """Build the kernel with static tiling parameters baked in."""
    group = (rows_per_tile % 8 == 0) and (rows_per_tile > 8)

    def _accumulate(sq, acc_ref):
        if group:
            # (rows, W) -> (rows//8, 8, W) keeps the natural (8, lanes) vreg
            # tiling, so the leading-axis sum is pure VPU adds (no XLU).
            acc_ref[...] += sq.reshape(rows_per_tile // 8, 8, W).sum(axis=0)
        else:
            acc_ref[...] += sq

    def kernel(z1_ref, z2_ref, out_ref, acc_ref):
        if two_d_grid:
            p = pl.program_id(0)           # TensorCore shard (parallel)
            i = pl.program_id(1)           # row-tile within shard (arbitrary)
            blk = p * tiles_per_p + i
            last_i = pl.num_programs(1) - 1
        else:
            i = pl.program_id(0)
            blk = i
            last_i = pl.num_programs(0) - 1

        @pl.when(i == 0)
        def _():
            acc_ref[...] = jnp.zeros_like(acc_ref)

        d = z1_ref[...].astype(jnp.float32) - z2_ref[...].astype(jnp.float32)

        if needs_mask:
            # Only tiles that can overhang the true row count pay for masking;
            # steady-state tiles run the bare sub/mul/add chain.
            is_edge = blk >= full_tiles

            @pl.when(jnp.logical_not(is_edge))
            def _():
                _accumulate(d * d, acc_ref)

            @pl.when(is_edge)
            def _():
                row = blk * rows_per_tile + lax.broadcasted_iota(
                    jnp.int32, (rows_per_tile, 1), 0)
                dm = jnp.where(row < R, d, 0.0)   # select: OOB NaNs are safe
                _accumulate(dm * dm, acc_ref)
        else:
            _accumulate(d * d, acc_ref)

        @pl.when(i == last_i)
        def _():
            # Single cross-lane/sublane reduce, once per shard.
            out_ref[0, 0] = jnp.sum(acc_ref[...])

    return kernel


def global_mse_loss(zg_1, zg_2, compute_1to2=True, compute_2to1=True,
                    block_bytes_hint=None):
    """Pallas implementation of GlobalMseLoss.forward.

    zg_1, zg_2: same shape (the module's contract is [B, d_z]).
    Returns (loss_or_None, loss_or_None, {}) exactly like the PyTorch module.
    `block_bytes_hint` optionally overrides the per-input block size (testing).
    """
    assert zg_1.shape == zg_2.shape
    N = int(zg_1.size)
    itemsize = jnp.dtype(zg_1.dtype).itemsize

    flat1 = zg_1.reshape(-1)
    flat2 = zg_2.reshape(-1)

    # Lane-dense view: widest lane width (multiple of 128) dividing N so the
    # (R, W) reshape is a free view of contiguous HBM.
    W = None
    for cand in (2048, 1024, 512, 256, 128):
        if N % cand == 0:
            W = cand
            break

    tail_sumsq = None
    if W is None:
        # Ragged element count: run the kernel on the largest 128-aligned
        # prefix and fold the (<128-element) tail with a tiny JAX reduction
        # (no full-array jnp.pad copy of both inputs).
        W = 128
        main = (N // W) * W
        if main == 0:
            # Tiny input (< 128 elements): plain JAX is cheaper than a kernel.
            d = flat1.astype(jnp.float32) - flat2.astype(jnp.float32)
            loss = (jnp.sum(d * d) / jnp.float32(N)).astype(jnp.float32)
            return (loss if compute_1to2 else None,
                    loss if compute_2to1 else None, {})
        t1 = flat1[main:].astype(jnp.float32)
        t2 = flat2[main:].astype(jnp.float32)
        tail_sumsq = jnp.sum((t1 - t2) ** 2)
        flat1 = flat1[:main]
        flat2 = flat2[:main]

    Np = int(flat1.shape[0])
    R = Np // W
    x1 = flat1.reshape(R, W)
    x2 = flat2.reshape(R, W)

    # --- Generation-aware tiling --------------------------------------------
    vmem_bytes, num_cores = _tpu_profile()
    if block_bytes_hint is not None:
        target_block_bytes = int(block_bytes_hint)
        vmem_cap = 46 * 1024 * 1024
    elif vmem_bytes <= 96 * 1024 * 1024:
        # v7x class: 64 MiB VMEM per TC, ~3.2 TB/s HBM -> ~4 MiB blocks.
        target_block_bytes = 4 * 1024 * 1024
        vmem_cap = 46 * 1024 * 1024
    else:
        # v5e / v6e class: 128 MiB VMEM -> push to ~8 MiB blocks.
        target_block_bytes = 8 * 1024 * 1024
        vmem_cap = 100 * 1024 * 1024

    align = 16 if itemsize < 4 else 8
    rows = (target_block_bytes // (W * itemsize)) // align * align
    rows = max(align, rows)
    rows_per_tile = R if rows >= R else rows

    t_total = _cdiv(R, rows_per_tile)
    full_tiles = R // rows_per_tile

    # Shard row-tiles across TensorCores only on multi-TC chips; on single-TC
    # parts keep a 1-D grid (no clamp/duplicate tile, no always-on mask).
    P = num_cores if (num_cores > 1 and t_total >= num_cores) else 1
    # TODO(synk): verify with xprof that the leading "parallel" axis really
    # shards across the 2 TCs on v7x; if not, switch it to pltpu.CORE_PARALLEL.

    two_d_grid = P > 1
    if two_d_grid:
        tiles_per_p = _cdiv(t_total, P)
        clamp = (P * tiles_per_p != t_total)
    else:
        tiles_per_p = t_total
        clamp = False
    needs_mask = (P * tiles_per_p * rows_per_tile != R)

    if two_d_grid:
        if clamp:
            def in_index_map(p, i):
                # Extra iterations re-read the last valid block; the in-kernel
                # row mask zeroes their contribution.
                return (jnp.minimum(p * tiles_per_p + i, t_total - 1), 0)
        else:
            def in_index_map(p, i):
                return (p * tiles_per_p + i, 0)
        out_index_map = lambda p, i: (p, 0)
        grid = (P, tiles_per_p)
        dim_sem = ("parallel", "arbitrary")
    else:
        in_index_map = lambda i: (i, 0)
        out_index_map = lambda i: (0, 0)
        grid = (tiles_per_p,)
        dim_sem = ("arbitrary",)

    acc_rows = 8 if (rows_per_tile % 8 == 0 and rows_per_tile > 8) else rows_per_tile

    # VMEM budget: 2 inputs x 2 pipeline buffers x block, plus room for the
    # f32 diff/square intermediates and the accumulator, capped per chip.
    block_bytes = rows_per_tile * W * itemsize
    f32_tile_bytes = rows_per_tile * W * 4
    acc_bytes = acc_rows * W * 4
    vmem_limit = 4 * block_bytes + 2 * f32_tile_bytes + acc_bytes + (4 << 20)
    vmem_limit = int(max(16 << 20, min(vmem_limit, vmem_cap)))

    kernel = _make_mse_kernel(rows_per_tile, W, R, tiles_per_p, full_tiles,
                              needs_mask, two_d_grid)

    partials = pl.pallas_call(
        kernel,
        out_shape=jax.ShapeDtypeStruct((P, 1), jnp.float32),
        grid_spec=pltpu.PrefetchScalarGridSpec(
            num_scalar_prefetch=0,
            grid=grid,
            in_specs=[
                pl.BlockSpec((rows_per_tile, W), in_index_map),
                pl.BlockSpec((rows_per_tile, W), in_index_map),
            ],
            out_specs=pl.BlockSpec((1, 1), out_index_map,
                                   memory_space=pltpu.SMEM),
            scratch_shapes=[pltpu.VMEM((acc_rows, W), jnp.float32)],
        ),
        compiler_params=pltpu.CompilerParams(
            dimension_semantics=dim_sem,
            vmem_limit_bytes=vmem_limit,
        ),
    )(x1, x2)

    total = jnp.sum(partials)
    if tail_sumsq is not None:
        total = total + tail_sumsq
    loss = (total / jnp.float32(N)).astype(jnp.float32)

    return (loss if compute_1to2 else None,
            loss if compute_2to1 else None,
            {})


if __name__ == "__main__":
    # GlobalMseLoss has no parameters (its __init__ only asserts the config).
    key = jax.random.PRNGKey(0)
    k1, k2, k3, k4, k5, k6, k7, k8 = jax.random.split(key, 8)

    # --- Small demo at the module's B x d_z convention ---
    B, d_z = 8, 32
    zg_1 = jax.random.normal(k1, (B, d_z), dtype=jnp.float32)
    zg_2 = jax.random.normal(k2, (B, d_z), dtype=jnp.float32)

    loss_1to2, loss_2to1, extras = global_mse_loss(zg_1, zg_2)
    loss_1to2 = jax.block_until_ready(loss_1to2)
    loss_2to1 = jax.block_until_ready(loss_2to1)
    ref = jnp.mean((zg_1 - zg_2) ** 2)
    assert extras == {}
    assert jnp.allclose(loss_1to2, ref, rtol=1e-6, atol=1e-6)
    assert jnp.allclose(loss_2to1, ref, rtol=1e-6, atol=1e-6)

    # --- Multi-tile grid + masked edge tile (forced via small block hint) ---
    a = jax.random.normal(k3, (1000, 256), dtype=jnp.float32)
    b = jax.random.normal(k4, (1000, 256), dtype=jnp.float32)
    l_mt, _, _ = global_mse_loss(a, b, block_bytes_hint=64 * 1024)
    l_mt = jax.block_until_ready(l_mt)
    assert jnp.allclose(l_mt, jnp.mean((a - b) ** 2), rtol=1e-5, atol=1e-7)

    # --- Ragged element count (tail folded in the wrapper, no pad copy) ---
    c = jax.random.normal(k5, (300, 130), dtype=jnp.float32)
    d = jax.random.normal(k6, (300, 130), dtype=jnp.float32)
    l_rg, _, _ = global_mse_loss(c, d)
    l_rg = jax.block_until_ready(l_rg)
    assert jnp.allclose(l_rg, jnp.mean((c - d) ** 2), rtol=1e-5, atol=1e-7)

    # --- bf16 inputs ---
    e = jax.random.normal(k7, (64, 256), dtype=jnp.bfloat16)
    f = jax.random.normal(k8, (64, 256), dtype=jnp.bfloat16)
    l_bf, _, _ = global_mse_loss(e, f)
    l_bf = jax.block_until_ready(l_bf)
    ref_bf = jnp.mean((e.astype(jnp.float32) - f.astype(jnp.float32)) ** 2)
    assert jnp.allclose(l_bf, ref_bf, rtol=1e-3, atol=1e-4)

    # --- compute_* flags behave like the PyTorch module ---
    l12, l21, _ = global_mse_loss(zg_1, zg_2, compute_1to2=True, compute_2to1=False)
    assert l21 is None
    assert jnp.allclose(jax.block_until_ready(l12), ref, rtol=1e-6, atol=1e-6)

    print("KERNEL_OK")
</pallas_src>

<mosaic_0001>
module attributes {stable_mosaic.version = 11 : i64} {
  func.func @kernel(%arg0: i32, %arg1: memref<1x256xf32, #tpu.memory_space<vmem>>, %arg2: memref<1x256xf32, #tpu.memory_space<vmem>>, %arg3: memref<1x1xf32, #tpu.memory_space<smem>>, %arg4: memref<1x256xf32, #tpu.memory_space<vmem>>) attributes {dimension_semantics = [#tpu.dimension_semantics<arbitrary>], iteration_bounds = array<i64: 1>, scalar_prefetch = 0 : i64, scratch_operands = 1 : i64, tpu.core_type = #tpu.core_type<tc>, window_params = [{transform_indices = @transform_0, window_bounds = array<i64: 1, 256>}, {transform_indices = @transform_1, window_bounds = array<i64: 1, 256>}, {transform_indices = @transform_2, window_bounds = array<i64: 1, 1>}]} {
    %c0_i32 = arith.constant 0 : i32
    %0 = arith.cmpi eq, %arg0, %c0_i32 : i32
    %1 = arith.extui %0 : i1 to i32
    %c0_i32_0 = arith.constant 0 : i32
    %2 = arith.cmpi ne, %1, %c0_i32_0 : i32
    scf.if %2 {
      %cst = arith.constant 0.000000e+00 : f32
      %13 = vector.broadcast %cst : f32 to vector<1x256xf32>
      %c0_10 = arith.constant 0 : index
      %c0_11 = arith.constant 0 : index
      %14 = vector.load %arg4[%c0_10, %c0_11] : memref<1x256xf32, #tpu.memory_space<vmem>>, vector<1x256xf32>
      tpu.vector_store %arg4[%c0_10, %c0_11], %13 {strides = array<i32>} : memref<1x256xf32, #tpu.memory_space<vmem>>, vector<1x256xf32>,
    } else {
    }
    %c0 = arith.constant 0 : index
    %c0_1 = arith.constant 0 : index
    %3 = vector.load %arg1[%c0, %c0_1] : memref<1x256xf32, #tpu.memory_space<vmem>>, vector<1x256xf32>
    %c0_2 = arith.constant 0 : index
    %c0_3 = arith.constant 0 : index
    %4 = vector.load %arg2[%c0_2, %c0_3] : memref<1x256xf32, #tpu.memory_space<vmem>>, vector<1x256xf32>
    %5 = arith.subf %3, %4 : vector<1x256xf32>
    %6 = arith.mulf %5, %5 : vector<1x256xf32>
    %c0_4 = arith.constant 0 : index
    %c0_5 = arith.constant 0 : index
    %7 = vector.load %arg4[%c0_4, %c0_5] : memref<1x256xf32, #tpu.memory_space<vmem>>, vector<1x256xf32>
    %8 = arith.addf %7, %6 : vector<1x256xf32>
    %c0_6 = arith.constant 0 : index
    %c0_7 = arith.constant 0 : index
    %9 = vector.load %arg4[%c0_6, %c0_7] : memref<1x256xf32, #tpu.memory_space<vmem>>, vector<1x256xf32>
    tpu.vector_store %arg4[%c0_6, %c0_7], %8 {strides = array<i32>} : memref<1x256xf32, #tpu.memory_space<vmem>>, vector<1x256xf32>,
    %c0_i32_8 = arith.constant 0 : i32
    %10 = arith.cmpi eq, %arg0, %c0_i32_8 : i32
    %11 = arith.extui %10 : i1 to i32
    %c0_i32_9 = arith.constant 0 : i32
    %12 = arith.cmpi ne, %11, %c0_i32_9 : i32
    scf.if %12 {
      %c0_10 = arith.constant 0 : index
      %c0_11 = arith.constant 0 : index
      %13 = vector.load %arg4[%c0_10, %c0_11] : memref<1x256xf32, #tpu.memory_space<vmem>>, vector<1x256xf32>
      %14 = vector.shape_cast %13 : vector<1x256xf32> to vector<1x1x256xf32>
      %cst = arith.constant dense<0.000000e+00> : vector<1xf32>
      %15 = vector.multi_reduction <add>, %14, %cst [1, 2] : vector<1x1x256xf32> to vector<1xf32>
      %16 = vector.shape_cast %15 : vector<1xf32> to vector<1x1x1xf32>
      %17 = vector.extract %16[0, 0, 0] : f32 from vector<1x1x1xf32>
      %c0_12 = arith.constant 0 : index
      %c0_13 = arith.constant 0 : index
      %18 = memref.load %arg3[%c0_12, %c0_13] : memref<1x1xf32, #tpu.memory_space<smem>>
      memref.store %17, %arg3[%c0_12, %c0_13] : memref<1x1xf32, #tpu.memory_space<smem>>
    } else {
    }
    return
  }
  func.func @transform_0(%arg0: i32) -> (i32, i32) {
    %c0_i32 = arith.constant 0 : i32
    %c0_i32_0 = arith.constant 0 : i32
    return %arg0, %c0_i32 : i32, i32
  }
  func.func @transform_1(%arg0: i32) -> (i32, i32) {
    %c0_i32 = arith.constant 0 : i32
    %c0_i32_0 = arith.constant 0 : i32
    return %arg0, %c0_i32 : i32, i32
  }
  func.func @transform_2(%arg0: i32) -> (i32, i32) {
    %c0_i32 = arith.constant 0 : i32
    %c0_i32_0 = arith.constant 0 : i32
    %c0_i32_1 = arith.constant 0 : i32
    return %c0_i32, %c0_i32_0 : i32, i32
  }
}

</mosaic_0001>

<bundles_post_ra>
// kernel: tpu_custom_call.1
= control target key start
LH: loop header
LB: loop body
LE: loop exit
PB: predicated region body
PF: predicated region fallthrough
CT: control target
= control target key end

     0   :  { %7 = vsyncpa [#allocation4], 0  ;;  %s201_s0 = inlined_call_operand.hbm [shape: f32[1,256], index: 0, kind: input, shape index: {}]   ;;  %s202_s1 = inlined_call_operand.hbm [shape: f32[1,256], index: 1, kind: input, shape index: {}]   ;;  %s203_s2 = inlined_call_operand.hbm [shape: f32[1,1], index: 2, kind: output, shape index: {}]  }
   0x1   :  { %8 = vsyncpa [#allocation7], 0 }
   0x2   :  { %9 = vsyncpa [#allocation5], 0  ;;  %s15_s11 = sshll.u32 %s201_s0, 4  ;;  %s173_s12 = smov [#allocation3]   ;;  %s16_s11 = int_to_ptr.hbm [resolvable:$true] %s15_s11 }
   0x3   :  { %s17_s13 = sshll.u32 %s173_s12, 4  ;;  %s26_s16 = sshll.u32 %s202_s1, 4  ;;  %s18_s13 = int_to_ptr.vmem [resolvable:$true] %s17_s13  ;;  %s27_s16 = int_to_ptr.hbm [resolvable:$true] %s26_s16 }
   0x4   :  { %20 = dma.hbm_to_vmem [thread:$0]  %s16_s11, 32, %s18_s13, [#allocation4]  }
   0x5   :  { %s174_s17 = smov [#allocation6]  }
   0x6   :  { %s28_s18 = sshll.u32 %s174_s17, 4  ;;  %s29_s18 = int_to_ptr.vmem [resolvable:$true] %s28_s18 }
   0x7   :  { %31 = dma.hbm_to_vmem [thread:$0]  %s27_s16, 32, %s29_s18, [#allocation7]  }
   0x8   :  { %167 = dma.done.wait [#allocation4], 32  }
   0x9   :  { %168 = vsyncadd [#allocation4], 4294967264 }
   0xa   :  { %169 = dma.done.wait [#allocation7], 32  }
   0xb   :  { %170 = vsyncadd [#allocation7], 4294967264  ;;  %v44_v0 = vlaneseq  ;;  %v175_v1 = vmov 0.0   ;;  %v49_v2 = vld [vmem:[#allocation3] sm:$0x3]  ;;  %vm69_vm1 = vcmask 1040384  }
   0xc   :  { %v50_v3 = vld [vmem:[#allocation6] sm:$0x3]  ;;  %s89_s19 = sshll.u32 %s203_s2, 4  ;;  %s176_s21 = smov [#allocation8]   ;;  %s90_s19 = int_to_ptr.hbm [resolvable:$true] %s89_s19 }
   0xd   :  { %vm46_vm0 = vcmp.lt.s32.totalorder %v44_v0, 256  ;;  %v51_v4 = vsub.f32 %v49_v2, %v50_v3 }
   0xe   :  { %48 = vst.msk [vmem:[#allocation2] sm:$0x3] %vm46_vm0, %v175_v1 }
   0xf   :  { %v52_v5 = vmul.f32 %v51_v4, %v51_v4 }
  0x15   :  { %v53_v6 = vld [vmem:[#allocation2] sm:$0x3] }
  0x16   :  { %v54_v7 = vadd.f32 %v53_v6, %v52_v5 }
  0x18   :  { %59 = vst.msk [vmem:[#allocation2] sm:$0x3] %vm46_vm0, %v54_v7 }
  0x1f   :  { %v63_v8 = vld [vmem:[#allocation2] sm:$0x3] }
  0x20   :  { %v65_v9 = vperm.slane %v63_v8, 0  ;;  %v66_v10 = vperm.slane %v63_v8, 1 }
  0x22   :  { %v70_v11 = vsel %vm69_vm1, %v65_v9, 0.0  ;;  %v71_v12 = vsel %vm69_vm1, %v66_v10, 0.0 }
  0x23   :  { %v72_v13 = vadd.f32 %v71_v12, %v70_v11 }
  0x25   :  { %73 = vadd.xlane.f32.xlu0 %v72_v13 }
  0x98   :  { %v74_v14 = vpop.xlane.xlu0 %73 }
  0x99   :  { %v75_v15 = vrot.slane %v74_v14, 4 }
  0x9b   :  { %v76_v16 = vadd.f32 %v75_v15, %v74_v14 }
  0x9d   :  { %v77_v17 = vrot.slane %v76_v16, 2 }
  0x9f   :  { %v78_v18 = vadd.f32 %v77_v17, %v76_v16 }
  0xa1   :  { %v79_v19 = vrot.slane %v78_v18, 1 }
  0xa3   :  { %v80_v20 = vadd.f32 %v79_v19, %v78_v18 }
  0xa5   :  { %101 = vpush %v80_v20 }
  0xd6   :  { %s102_s20 = spop %101 }
  0xd7   :  { %83 = sst [smem:[#allocation8]] %s102_s20 }
  0xd8   :  { %92 = dma.smem_to_hbm %s176_s21, 16, %s90_s19, [#allocation5]  }
  0xd9   :  { %171 = dma.done.wait [#allocation5], 16  }
  0xda   :  { %172 = vsyncadd [#allocation5], 4294967280 }
  0xdb   :  { %97 = sfence }
  0xdc   :  { %98 = vsyncpa [#allocation4], 1 }
  0xdd   :  { %99 = vsyncpa [#allocation7], 1 }
  0xde   :  { %100 = vsyncpa [#allocation5], 1 }

</bundles_post_ra>
